<compile_context>
chip_gen: v6e
topology: v6e:2x2x1
jax: 0.10.0
libtpu: 0.0.40
codegen_flags: <defaults>
</compile_context>

<pallas_src>
import math
import numpy as np
import jax
import jax.numpy as jnp
from jax.experimental import pallas as pl
from jax.experimental.pallas import tpu as pltpu

# ----------------------------- model dims -----------------------------------
L = 8            # sequence length
N = 2            # batch
E = 32           # hidden_size
F = 64           # ff_size
H = 8            # num_heads (fixed by the module)
D = E // H       # head_dim
NL = L * N       # stacked (seq, batch) rows
HNL = H * NL     # 128 — stacked (head, key) lanes
SCALE = 1.0 / math.sqrt(D)
LN_EPS = 1e-5
NEG = jnp.float32(-1e30)

# ----------------------- packed parameter-slab layout -------------------------
ROW_PROJ = 0              # rows [0, 32):   [Wk | Wv | 0 | Wq*scale]      (E, 4E)
ROW_FF   = E              # rows [32, 64):  [W1 | W2^T]                   (E, 2F)
ROW_WO   = 2 * E          # rows [64, 96):  lanes [0, E) = Wo             (E, E)
ROW_VEC  = 3 * E          # rows 96..98:    bias / LayerNorm vectors
ROW_MASK = ROW_VEC + 8    # rows [104,232): lanes [0, 3E) = [M | M | M]   (H*NL, 3E)
W_ROWS   = ROW_MASK + HNL  # 232


# ------------------------------ kernel ---------------------------------------
def _layer_norm(v, g, b):
    mu = jnp.mean(v, axis=-1, keepdims=True)
    var = jnp.mean((v - mu) ** 2, axis=-1, keepdims=True)
    return (v - mu) * jax.lax.rsqrt(var + LN_EPS) * g + b


def encoder_layer_kernel(xb_ref, w_ref, o_ref):
    f32 = jnp.float32
    bias = xb_ref[:, 0:HNL]                              # (NL, H*NL) pre-tiled additive bias
    x = xb_ref[:, HNL:HNL + E].astype(f32)               # (NL, E), row r = seq*N + batch

    # ---- unpack parameter/constant slab (static slices) ----
    w_proj = w_ref[ROW_PROJ:ROW_PROJ + E, :]             # (E, 4E)  [Wk | Wv | 0 | Wq*scale]
    w_1    = w_ref[ROW_FF:ROW_FF + E, 0:F]               # (E, F)
    w_2t   = w_ref[ROW_FF:ROW_FF + E, F:2 * F]           # (E, F) == W2^T
    w_o    = w_ref[ROW_WO:ROW_WO + E, 0:E]               # (E, E)
    b_proj = w_ref[ROW_VEC:ROW_VEC + 1, :]               # (1, 4E)  [bk | bv | 1 | bq*scale]
    b_o    = w_ref[ROW_VEC + 1:ROW_VEC + 2, 0:E]         # (1, E)
    b_1    = w_ref[ROW_VEC + 1:ROW_VEC + 2, E:E + F]     # (1, F)
    b_2    = w_ref[ROW_VEC + 1:ROW_VEC + 2, E + F:2 * E + F]   # (1, E)
    g_1    = w_ref[ROW_VEC + 2:ROW_VEC + 3, 0:E]
    be_1   = w_ref[ROW_VEC + 2:ROW_VEC + 3, E:2 * E]
    g_2    = w_ref[ROW_VEC + 2:ROW_VEC + 3, 2 * E:3 * E]
    be_2   = w_ref[ROW_VEC + 2:ROW_VEC + 3, 3 * E:4 * E]
    m3     = w_ref[ROW_MASK:ROW_MASK + HNL, 0:3 * E]     # (H*NL, 3E) precomputed [M | M | M]

    # ---- fused projection: one matmul yields [K | V | ones | Q*scale] ----
    proj = jnp.dot(x, w_proj, preferred_element_type=f32) + b_proj    # (NL, 4E)
    kv1 = proj[:, 0:3 * E]            # (NL, 3E): [k | v | 1]
    q = proj[:, 3 * E:4 * E]          # (NL, E), already scaled by 1/sqrt(D)

    # ---- block-masked key/value stacks: one concat + one multiply ----
    stacked = jnp.concatenate([kv1] * H, axis=0) * m3    # (H*NL, 3E)
    k_blk = stacked[:, 0:E]           # row h*NL+c = k[c] masked to head-h lanes
    vm_blk = stacked[:, E:3 * E]      # (H*NL, 2E): [V_blk | head-mask] -> num & den in one matmul

    # ---- lane-dense attention: scores / exp are (NL, H*NL) = (16, 128) ----
    dims = (((1,), (1,)), ((), ()))                      # contract last dims (A @ B^T)
    s = jax.lax.dot_general(q, k_blk, dims, preferred_element_type=f32) + bias   # (NL, H*NL)
    s = s - jnp.max(s, axis=-1, keepdims=True)           # per-row constant: per-head softmax unchanged
    e = jnp.exp(s)                                       # 2 vregs of EUP work (was 16)
    numden = jnp.dot(e, vm_blk, preferred_element_type=f32)   # (NL, 2E)
    num = numden[:, 0:E]                                 # per-head unnormalized outputs (lane-blocked)
    den = numden[:, E:2 * E]                             # per-head softmax denominators
    r = pl.reciprocal(den, approx=True)
    r = r * (2.0 - den * r)                              # one Newton step (~1e-7 rel. error)
    attn = num * r                                       # (NL, E) == concat of head outputs

    attn_out = jnp.dot(attn, w_o, preferred_element_type=f32) + b_o

    # ---- residual + LayerNorm 1 ----
    y1 = _layer_norm(x + attn_out, g_1, be_1)

    # ---- feed-forward: Linear -> ReLU -> Linear (W2 applied via its transpose) ----
    hdn = jnp.maximum(jnp.dot(y1, w_1, preferred_element_type=f32) + b_1, 0.0)
    ff = jax.lax.dot_general(hdn, w_2t, dims, preferred_element_type=f32) + b_2

    # ---- residual + LayerNorm 2 ----
    y2 = _layer_norm(y1 + ff, g_2, be_2)

    o_ref[...] = y2.astype(o_ref.dtype)


# ------------------------------ wrapper --------------------------------------
def _pack_constants(p):
    """Pack every weight / bias / LayerNorm vector / head mask into one
    (232, 128) f32 slab (single DMA; all kernel slices are static)."""
    f32 = jnp.float32
    w_proj = jnp.concatenate(
        [p["wk"], p["wv"], jnp.zeros((E, E), f32), p["wq"] * SCALE], axis=1)     # (E, 4E)
    b_proj = jnp.concatenate(
        [p["bk"], p["bv"], jnp.ones((1, E), f32), p["bq"] * SCALE], axis=1)      # (1, 4E)
    w_ff = jnp.concatenate([p["w1"], p["w2"].T], axis=1)                         # (E, 2F)
    w_o = jnp.concatenate([p["wo"], jnp.zeros((E, 3 * E), f32)], axis=1)         # (E, 4E)
    vec2 = jnp.concatenate([p["bo"], p["b1"], p["b2"]], axis=1)                  # (1, 4E)
    vec3 = jnp.concatenate([p["g1"], p["be1"], p["g2"], p["be2"]], axis=1)       # (1, 4E)
    pad = jnp.zeros((ROW_MASK - (ROW_VEC + 3), 4 * E), f32)

    # head masks: M[h*NL + c, e] = 1 iff lane e belongs to head h
    head_of_row = np.repeat(np.arange(H), NL)                 # (H*NL,)
    head_of_lane = np.arange(E) // D                          # (E,)
    m = (head_of_row[:, None] == head_of_lane[None, :]).astype(np.float32)
    m3 = np.concatenate([m, m, m, np.zeros((HNL, E), np.float32)], axis=1)       # (H*NL, 4E)

    slab = jnp.concatenate(
        [w_proj, w_ff, w_o, b_proj, vec2, vec3, pad, jnp.asarray(m3)], axis=0)   # (232, 128)
    assert slab.shape == (W_ROWS, 4 * E)
    return slab


def encoder_layer(x_lne, mask_bool, p):
    """x_lne: (L, N, E) float32 (seq-first, like PyTorch); mask_bool: (N, L) bool."""
    f32 = jnp.float32
    x2d = x_lne.astype(f32).reshape(NL, E)        # pure reshape: row r = seq*N + batch

    # Additive bias: 0 where (same batch AND key not padded) else -1e30 (never -2e30),
    # pre-tiled per head along lanes -> (NL, H*NL).
    kp = jnp.where(mask_bool, NEG, f32(0.0)).T.reshape(1, NL)     # key row c = l*N + b
    ridx = jnp.arange(NL) % N                                     # batch id of each row
    same_batch = ridx[:, None] == ridx[None, :]
    bias = jnp.where(same_batch, jnp.broadcast_to(kp, (NL, NL)), NEG)   # (NL, NL)
    bias_tiled = jnp.tile(bias, (1, H))                                  # (NL, H*NL)

    xb = jnp.concatenate([bias_tiled, x2d], axis=1)                      # (NL, H*NL + E)
    wslab = _pack_constants(p)

    vmem = pl.BlockSpec(memory_space=pltpu.MemorySpace.VMEM)
    out2d = pl.pallas_call(
        encoder_layer_kernel,
        out_shape=jax.ShapeDtypeStruct((NL, E), f32),
        in_specs=[vmem, vmem],
        out_specs=vmem,
    )(xb, wslab)

    return out2d.reshape(L, N, E)                                        # back to seq-first


# ---------------------------- pure-JAX reference ------------------------------
def encoder_layer_ref(x_lne, mask_bool, p):
    x = jnp.transpose(x_lne, (1, 0, 2)).astype(jnp.float32)              # (N, L, E)
    mask_add = jnp.where(mask_bool, -1e30, 0.0).astype(jnp.float32)

    q = x @ p["wq"] + p["bq"]
    k = x @ p["wk"] + p["bk"]
    v = x @ p["wv"] + p["bv"]
    qh = q.reshape(N, L, H, D).transpose(0, 2, 1, 3)
    kh = k.reshape(N, L, H, D).transpose(0, 2, 1, 3)
    vh = v.reshape(N, L, H, D).transpose(0, 2, 1, 3)
    s = jnp.einsum("nhld,nhmd->nhlm", qh, kh) * SCALE
    s = s + mask_add[:, None, None, :]
    a = jax.nn.softmax(s, axis=-1)
    attn = jnp.einsum("nhlm,nhmd->nhld", a, vh).transpose(0, 2, 1, 3).reshape(N, L, E)
    attn = attn @ p["wo"] + p["bo"]

    def ln(v_, g, b):
        mu = jnp.mean(v_, axis=-1, keepdims=True)
        var = jnp.mean((v_ - mu) ** 2, axis=-1, keepdims=True)
        return (v_ - mu) / jnp.sqrt(var + LN_EPS) * g + b

    y1 = ln(x + attn, p["g1"], p["be1"])
    ff = jnp.maximum(y1 @ p["w1"] + p["b1"], 0.0) @ p["w2"] + p["b2"]
    y2 = ln(y1 + ff, p["g2"], p["be2"])
    return jnp.transpose(y2, (1, 0, 2))


# --------------------------------- main ---------------------------------------
def make_params(key):
    ks = jax.random.split(key, 12)
    f32 = jnp.float32
    def rnd(k, shape, scale):
        return (jax.random.normal(k, shape, f32) * scale).astype(f32)
    p = {
        # attention in/out projections (stored pre-transposed: y = x @ W + b)
        "wq": rnd(ks[0], (E, E), 1 / math.sqrt(E)),
        "wk": rnd(ks[1], (E, E), 1 / math.sqrt(E)),
        "wv": rnd(ks[2], (E, E), 1 / math.sqrt(E)),
        "bq": rnd(ks[3], (1, E), 0.1),
        "bk": rnd(ks[4], (1, E), 0.1),
        "bv": rnd(ks[5], (1, E), 0.1),
        "wo": rnd(ks[6], (E, E), 1 / math.sqrt(E)),
        "bo": rnd(ks[7], (1, E), 0.1),
        # feed-forward
        "w1": rnd(ks[8], (E, F), 1 / math.sqrt(E)),
        "b1": rnd(ks[9], (1, F), 0.1),
        "w2": rnd(ks[10], (F, E), 1 / math.sqrt(F)),
        "b2": rnd(ks[11], (1, E), 0.1),
        # layer norms (PyTorch defaults: weight=1, bias=0)
        "g1": jnp.ones((1, E), f32), "be1": jnp.zeros((1, E), f32),
        "g2": jnp.ones((1, E), f32), "be2": jnp.zeros((1, E), f32),
    }
    return p


if __name__ == "__main__":
    key = jax.random.PRNGKey(0)
    kx, kp = jax.random.split(key)
    params = make_params(kp)

    x = jax.random.normal(kx, (L, N, E), jnp.float32)       # (seq, batch, hidden)
    # key_padding_mask: last two positions of each sequence are padding (True = masked)
    # NOTE: like PyTorch, a fully-masked row would produce NaN/undefined softmax.
    mask = jnp.zeros((N, L), jnp.bool_).at[:, -2:].set(True)

    out = jax.block_until_ready(encoder_layer(x, mask, params))
    ref = jax.block_until_ready(encoder_layer_ref(x, mask, params))

    np.testing.assert_allclose(np.asarray(out), np.asarray(ref), rtol=1e-4, atol=1e-4)
    assert out.shape == (L, N, E)
    print("KERNEL_OK")
</pallas_src>

<mosaic_0001>
module attributes {stable_mosaic.version = 11 : i64} {
  func.func @encoder_layer_kernel(%arg0: memref<16x160xf32, #tpu.memory_space<vmem>>, %arg1: memref<232x128xf32, #tpu.memory_space<vmem>>, %arg2: memref<16x32xf32, #tpu.memory_space<vmem>>) attributes {dimension_semantics = [], scalar_prefetch = 0 : i64, scratch_operands = 0 : i64, tpu.core_type = #tpu.core_type<tc>} {
    %c0 = arith.constant 0 : index
    %c0_0 = arith.constant 0 : index
    %0 = vector.load %arg0[%c0, %c0_0] : memref<16x160xf32, #tpu.memory_space<vmem>>, vector<16x128xf32>
    %c0_1 = arith.constant 0 : index
    %c128 = arith.constant 128 : index
    %1 = vector.load %arg0[%c0_1, %c128] : memref<16x160xf32, #tpu.memory_space<vmem>>, vector<16x32xf32>
    %c0_2 = arith.constant 0 : index
    %c0_3 = arith.constant 0 : index
    %2 = vector.load %arg1[%c0_2, %c0_3] : memref<232x128xf32, #tpu.memory_space<vmem>>, vector<32x128xf32>
    %c32 = arith.constant 32 : index
    %c0_4 = arith.constant 0 : index
    %3 = vector.load %arg1[%c32, %c0_4] : memref<232x128xf32, #tpu.memory_space<vmem>>, vector<32x64xf32>
    %c32_5 = arith.constant 32 : index
    %c64 = arith.constant 64 : index
    %4 = vector.load %arg1[%c32_5, %c64] : memref<232x128xf32, #tpu.memory_space<vmem>>, vector<32x64xf32>
    %c64_6 = arith.constant 64 : index
    %c0_7 = arith.constant 0 : index
    %5 = vector.load %arg1[%c64_6, %c0_7] : memref<232x128xf32, #tpu.memory_space<vmem>>, vector<32x32xf32>
    %c96 = arith.constant 96 : index
    %c0_8 = arith.constant 0 : index
    %6 = vector.load %arg1[%c96, %c0_8] : memref<232x128xf32, #tpu.memory_space<vmem>>, vector<1x128xf32>
    %c97 = arith.constant 97 : index
    %c0_9 = arith.constant 0 : index
    %7 = vector.load %arg1[%c97, %c0_9] : memref<232x128xf32, #tpu.memory_space<vmem>>, vector<1x32xf32>
    %c97_10 = arith.constant 97 : index
    %c32_11 = arith.constant 32 : index
    %8 = vector.load %arg1[%c97_10, %c32_11] : memref<232x128xf32, #tpu.memory_space<vmem>>, vector<1x64xf32>
    %c97_12 = arith.constant 97 : index
    %c96_13 = arith.constant 96 : index
    %9 = vector.load %arg1[%c97_12, %c96_13] : memref<232x128xf32, #tpu.memory_space<vmem>>, vector<1x32xf32>
    %c98 = arith.constant 98 : index
    %c0_14 = arith.constant 0 : index
    %10 = vector.load %arg1[%c98, %c0_14] : memref<232x128xf32, #tpu.memory_space<vmem>>, vector<1x32xf32>
    %c98_15 = arith.constant 98 : index
    %c32_16 = arith.constant 32 : index
    %11 = vector.load %arg1[%c98_15, %c32_16] : memref<232x128xf32, #tpu.memory_space<vmem>>, vector<1x32xf32>
    %c98_17 = arith.constant 98 : index
    %c64_18 = arith.constant 64 : index
    %12 = vector.load %arg1[%c98_17, %c64_18] : memref<232x128xf32, #tpu.memory_space<vmem>>, vector<1x32xf32>
    %c98_19 = arith.constant 98 : index
    %c96_20 = arith.constant 96 : index
    %13 = vector.load %arg1[%c98_19, %c96_20] : memref<232x128xf32, #tpu.memory_space<vmem>>, vector<1x32xf32>
    %c104 = arith.constant 104 : index
    %c0_21 = arith.constant 0 : index
    %14 = vector.load %arg1[%c104, %c0_21] : memref<232x128xf32, #tpu.memory_space<vmem>>, vector<128x96xf32>
    %cst = arith.constant dense<0.000000e+00> : vector<16x128xf32>
    %15 = tpu.matmul %1, %2, %cst {dimension_numbers = #tpu.dot_dimension_numbers<[1], [0], [0], [1], [0, 0, 1, 1], [], []>} : vector<16x32xf32>, vector<32x128xf32>, vector<16x128xf32> -> vector<16x128xf32>
    %16 = vector.broadcast %6 : vector<1x128xf32> to vector<16x128xf32>
    %17 = arith.addf %15, %16 : vector<16x128xf32>
    %18 = vector.extract_strided_slice %17 {offsets = [0, 0], sizes = [16, 96], strides = [1, 1]} : vector<16x128xf32> to vector<16x96xf32>
    %19 = vector.extract_strided_slice %17 {offsets = [0, 96], sizes = [16, 32], strides = [1, 1]} : vector<16x128xf32> to vector<16x32xf32>
    %20 = tpu.concatenate %18, %18, %18, %18, %18, %18, %18, %18 in 0 : vector<16x96xf32>, vector<16x96xf32>, vector<16x96xf32>, vector<16x96xf32>, vector<16x96xf32>, vector<16x96xf32>, vector<16x96xf32>, vector<16x96xf32> -> vector<128x96xf32>
    %21 = arith.mulf %20, %14 : vector<128x96xf32>
    %22 = vector.extract_strided_slice %21 {offsets = [0, 0], sizes = [128, 32], strides = [1, 1]} : vector<128x96xf32> to vector<128x32xf32>
    %23 = vector.extract_strided_slice %21 {offsets = [0, 32], sizes = [128, 64], strides = [1, 1]} : vector<128x96xf32> to vector<128x64xf32>
    %cst_22 = arith.constant dense<0.000000e+00> : vector<16x128xf32>
    %24 = tpu.matmul %19, %22, %cst_22 {dimension_numbers = #tpu.dot_dimension_numbers<[1], [1], [0], [0], [0, 0, 1, 0], [], []>} : vector<16x32xf32>, vector<128x32xf32>, vector<16x128xf32> -> vector<16x128xf32>
    %25 = arith.addf %24, %0 : vector<16x128xf32>
    %cst_23 = arith.constant dense<0xFF800000> : vector<16xf32>
    %26 = vector.multi_reduction <maximumf>, %25, %cst_23 [1] : vector<16x128xf32> to vector<16xf32>
    %27 = vector.shape_cast %26 : vector<16xf32> to vector<16x1xf32>
    %28 = vector.broadcast %27 : vector<16x1xf32> to vector<16x128xf32>
    %29 = arith.subf %25, %28 : vector<16x128xf32>
    %30 = math.exp %29 : vector<16x128xf32>
    %cst_24 = arith.constant dense<0.000000e+00> : vector<16x64xf32>
    %31 = tpu.matmul %30, %23, %cst_24 {dimension_numbers = #tpu.dot_dimension_numbers<[1], [0], [0], [1], [0, 0, 1, 1], [], []>} : vector<16x128xf32>, vector<128x64xf32>, vector<16x64xf32> -> vector<16x64xf32>
    %32 = vector.extract_strided_slice %31 {offsets = [0, 0], sizes = [16, 32], strides = [1, 1]} : vector<16x64xf32> to vector<16x32xf32>
    %33 = vector.extract_strided_slice %31 {offsets = [0, 32], sizes = [16, 32], strides = [1, 1]} : vector<16x64xf32> to vector<16x32xf32>
    %34 = tpu.reciprocal %33 {approx = true} : vector<16x32xf32> -> vector<16x32xf32>
    %35 = arith.mulf %33, %34 : vector<16x32xf32>
    %cst_25 = arith.constant 2.000000e+00 : f32
    %36 = vector.broadcast %cst_25 : f32 to vector<16x32xf32>
    %37 = arith.subf %36, %35 : vector<16x32xf32>
    %38 = arith.mulf %34, %37 : vector<16x32xf32>
    %39 = arith.mulf %32, %38 : vector<16x32xf32>
    %cst_26 = arith.constant dense<0.000000e+00> : vector<16x32xf32>
    %40 = tpu.matmul %39, %5, %cst_26 {dimension_numbers = #tpu.dot_dimension_numbers<[1], [0], [0], [1], [0, 0, 1, 1], [], []>} : vector<16x32xf32>, vector<32x32xf32>, vector<16x32xf32> -> vector<16x32xf32>
    %41 = vector.broadcast %7 : vector<1x32xf32> to vector<16x32xf32>
    %42 = arith.addf %40, %41 : vector<16x32xf32>
    %43 = arith.addf %1, %42 : vector<16x32xf32>
    %cst_27 = arith.constant dense<0.000000e+00> : vector<16xf32>
    %44 = vector.multi_reduction <add>, %43, %cst_27 [1] : vector<16x32xf32> to vector<16xf32>
    %45 = vector.shape_cast %44 : vector<16xf32> to vector<16x1xf32>
    %cst_28 = arith.constant 3.200000e+01 : f32
    %46 = vector.broadcast %cst_28 : f32 to vector<16x1xf32>
    %47 = arith.divf %45, %46 : vector<16x1xf32>
    %48 = vector.broadcast %47 : vector<16x1xf32> to vector<16x32xf32>
    %49 = arith.subf %43, %48 : vector<16x32xf32>
    %50 = arith.mulf %49, %49 : vector<16x32xf32>
    %cst_29 = arith.constant dense<0.000000e+00> : vector<16xf32>
    %51 = vector.multi_reduction <add>, %50, %cst_29 [1] : vector<16x32xf32> to vector<16xf32>
    %52 = vector.shape_cast %51 : vector<16xf32> to vector<16x1xf32>
    %cst_30 = arith.constant 3.200000e+01 : f32
    %53 = vector.broadcast %cst_30 : f32 to vector<16x1xf32>
    %54 = arith.divf %52, %53 : vector<16x1xf32>
    %55 = vector.broadcast %47 : vector<16x1xf32> to vector<16x32xf32>
    %56 = arith.subf %43, %55 : vector<16x32xf32>
    %cst_31 = arith.constant 9.99999974E-6 : f32
    %57 = vector.broadcast %cst_31 : f32 to vector<16x1xf32>
    %58 = arith.addf %54, %57 : vector<16x1xf32>
    %59 = math.rsqrt %58 : vector<16x1xf32>
    %60 = vector.broadcast %59 : vector<16x1xf32> to vector<16x32xf32>
    %61 = arith.mulf %56, %60 : vector<16x32xf32>
    %62 = vector.broadcast %10 : vector<1x32xf32> to vector<16x32xf32>
    %63 = arith.mulf %61, %62 : vector<16x32xf32>
    %64 = vector.broadcast %11 : vector<1x32xf32> to vector<16x32xf32>
    %65 = arith.addf %63, %64 : vector<16x32xf32>
    %cst_32 = arith.constant dense<0.000000e+00> : vector<16x64xf32>
    %66 = tpu.matmul %65, %3, %cst_32 {dimension_numbers = #tpu.dot_dimension_numbers<[1], [0], [0], [1], [0, 0, 1, 1], [], []>} : vector<16x32xf32>, vector<32x64xf32>, vector<16x64xf32> -> vector<16x64xf32>
    %67 = vector.broadcast %8 : vector<1x64xf32> to vector<16x64xf32>
    %68 = arith.addf %66, %67 : vector<16x64xf32>
    %cst_33 = arith.constant 0.000000e+00 : f32
    %69 = vector.broadcast %cst_33 : f32 to vector<16x64xf32>
    %70 = arith.maximumf %68, %69 : vector<16x64xf32>
    %cst_34 = arith.constant dense<0.000000e+00> : vector<16x32xf32>
    %71 = tpu.matmul %70, %4, %cst_34 {dimension_numbers = #tpu.dot_dimension_numbers<[1], [1], [0], [0], [0, 0, 1, 0], [], []>} : vector<16x64xf32>, vector<32x64xf32>, vector<16x32xf32> -> vector<16x32xf32>
    %72 = vector.broadcast %9 : vector<1x32xf32> to vector<16x32xf32>
    %73 = arith.addf %71, %72 : vector<16x32xf32>
    %74 = arith.addf %65, %73 : vector<16x32xf32>
    %cst_35 = arith.constant dense<0.000000e+00> : vector<16xf32>
    %75 = vector.multi_reduction <add>, %74, %cst_35 [1] : vector<16x32xf32> to vector<16xf32>
    %76 = vector.shape_cast %75 : vector<16xf32> to vector<16x1xf32>
    %cst_36 = arith.constant 3.200000e+01 : f32
    %77 = vector.broadcast %cst_36 : f32 to vector<16x1xf32>
    %78 = arith.divf %76, %77 : vector<16x1xf32>
    %79 = vector.broadcast %78 : vector<16x1xf32> to vector<16x32xf32>
    %80 = arith.subf %74, %79 : vector<16x32xf32>
    %81 = arith.mulf %80, %80 : vector<16x32xf32>
    %cst_37 = arith.constant dense<0.000000e+00> : vector<16xf32>
    %82 = vector.multi_reduction <add>, %81, %cst_37 [1] : vector<16x32xf32> to vector<16xf32>
    %83 = vector.shape_cast %82 : vector<16xf32> to vector<16x1xf32>
    %cst_38 = arith.constant 3.200000e+01 : f32
    %84 = vector.broadcast %cst_38 : f32 to vector<16x1xf32>
    %85 = arith.divf %83, %84 : vector<16x1xf32>
    %86 = vector.broadcast %78 : vector<16x1xf32> to vector<16x32xf32>
    %87 = arith.subf %74, %86 : vector<16x32xf32>
    %cst_39 = arith.constant 9.99999974E-6 : f32
    %88 = vector.broadcast %cst_39 : f32 to vector<16x1xf32>
    %89 = arith.addf %85, %88 : vector<16x1xf32>
    %90 = math.rsqrt %89 : vector<16x1xf32>
    %91 = vector.broadcast %90 : vector<16x1xf32> to vector<16x32xf32>
    %92 = arith.mulf %87, %91 : vector<16x32xf32>
    %93 = vector.broadcast %12 : vector<1x32xf32> to vector<16x32xf32>
    %94 = arith.mulf %92, %93 : vector<16x32xf32>
    %95 = vector.broadcast %13 : vector<1x32xf32> to vector<16x32xf32>
    %96 = arith.addf %94, %95 : vector<16x32xf32>
    %c0_40 = arith.constant 0 : index
    %c0_41 = arith.constant 0 : index
    %97 = vector.load %arg2[%c0_40, %c0_41] : memref<16x32xf32, #tpu.memory_space<vmem>>, vector<16x32xf32>
    tpu.vector_store %arg2[%c0_40, %c0_41], %96 {strides = array<i32>} : memref<16x32xf32, #tpu.memory_space<vmem>>, vector<16x32xf32>,
    return
  }
}

</mosaic_0001>

<bundles_post_ra>
// kernel: tpu_custom_call.1
= control target key start
LH: loop header
LB: loop body
LE: loop exit
PB: predicated region body
PF: predicated region fallthrough
CT: control target
= control target key end

     0   :  { %7 = vsyncpa [#allocation3], 0  ;;  %s1302_s0 = inlined_call_operand.hbm [shape: f32[16,160], index: 0, kind: input, shape index: {}]   ;;  %s1303_s1 = inlined_call_operand.hbm [shape: f32[232,128], index: 1, kind: input, shape index: {}]   ;;  %s1304_s2 = inlined_call_operand.hbm [shape: f32[16,32], index: 2, kind: output, shape index: {}]  }
   0x1   :  { %8 = vsyncpa [#allocation6], 0 }
   0x2   :  { %9 = vsyncpa [#allocation4], 0  ;;  %s1136_s9 = smov [#allocation2]  }
   0x3   :  { %s15_s10 = sshll.u32 %s1136_s9, 4  ;;  %s16_s10 = int_to_ptr.vmem [resolvable:$true] %s15_s10 }
   0x4   :  { %s1078_s11 = scalar_lea.vmem %s16_s10, 512  ;;  %p1083_p1 = scmp.lt.s32.totalorder %s16_s10, %s16_s10 }
   0x5   :  { %p1079_p0 = scmp.ne.s32.totalorder %s16_s10, %s1078_s11  ;;  %p1084_p2 = scmp.lt.s32.totalorder %s1078_s11, %s1078_s11 }
   0x7   :  { %p1085_p3 = por %p1084_p2, %p1083_p1 }
   0x9   :  { %p1086_p4 = pnand %p1085_p3, %p1079_p0 }
   0xb   :  { %1089 = shalt.err (!%p1086_p4)
}
   0xc   :  { %s1137_s12 = smov 256   ;;  %s1138_s13 = smov 16  }
   0xd   :  { %21 = dma.hbm_to_vmem [thread:$0]  %s1302_s0, 512, %s16_s10, [#allocation3], %s1137_s12, %s1137_s12, %s1138_s13  }
   0xe   :  { %s1139_s16 = smov [#allocation5]  }
   0xf   :  { %s27_s17 = sshll.u32 %s1139_s16, 4  ;;  %s28_s17 = int_to_ptr.vmem [resolvable:$true] %s27_s17 }
  0x10   :  { %s1098_s18 = scalar_lea.vmem %s28_s17, 3712  ;;  %p1103_p6 = scmp.lt.s32.totalorder %s28_s17, %s28_s17 }
  0x11   :  { %p1099_p5 = scmp.ne.s32.totalorder %s28_s17, %s1098_s18  ;;  %p1104_p7 = scmp.lt.s32.totalorder %s1098_s18, %s1098_s18 }
  0x13   :  { %p1105_p8 = por %p1104_p7, %p1103_p6 }
  0x15   :  { %p1106_p9 = pnand %p1105_p8, %p1099_p5 }
  0x17   :  { %1109 = shalt.err (!%p1106_p9)
}
  0x18   :  { %s1140_s19 = smov 128   ;;  %s1141_s20 = smov 8  }
  0x19   :  { %33 = dma.hbm_to_vmem [thread:$0]  %s1303_s1, 3712, %s28_s17, [#allocation6], %s1140_s19, %s1140_s19, %s1141_s20  }
  0x1a   :  { %1130 = dma.done.wait [#allocation3], 512  }
  0x1b   :  { %1131 = vsyncadd [#allocation3], 4294966784 }
  0x1c   :  { %1132 = dma.done.wait [#allocation6], 3712  }
  0x1d   :  { %1133 = vsyncadd [#allocation6], 4294963584  ;;  %vm79_vm0 = vcmask 261120   ;;  %v47_v0 = vld [vmem:[#allocation5 + $0x18] sm:$0xff]  ;;  %v46_v1 = vld [vmem:[#allocation5 + $0x10] sm:$0xff]  ;;  %s1142_s0 = smov 96  }
  0x1e   :  { %930 = vmatprep.subr.mxu0 %v47_v0  ;;  %v1170_v2 = vld [vmem:[#allocation2 + $0x8] sm:$0xff]  ;;  %v44_v4 = vld [vmem:[#allocation5] sm:$0xff]  ;;  %v1174_v5 = vld [vmem:[#allocation2 + $0x18] sm:$0xff]  ;;  %s1143_s1 = smov 32   ;;  %s1144_s23 = smov 64   ;;  %vm689_vm1 = vcmask 523264  }
  0x1f   :  { %931 = vmatpush3.msra.mxu0 %v47_v0  ;;  %v45_v3 = vld [vmem:[#allocation5 + $0x8] sm:$0xff]  ;;  %938 = vmatprep.mubr.msk.f32.mxu0 %vm79_vm0, %v1170_v2  ;;  %v837_v6 = vld [vmem:[#allocation5 + $0x60] ss:$0 sm:$0xff]  ;;  %v73_v11 = vld [vmem:[#allocation5 + $0xd8] sm:$0xff]  ;;  %s1145_s24 = smov [#allocation7]  }
  0x20   :  { %932 = vmatprep.subr.mxu0 %v46_v1  ;;  %v74_v8 = vld [vmem:[#allocation5 + $0xe0] sm:$0xff]  ;;  %v72_v14 = vld [vmem:[#allocation5 + $0xd0] sm:$0xff]  ;;  %v71_v17 = vld [vmem:[#allocation5 + $0xc8] sm:$0xff]  ;;  %s824_s25 = sshll.u32 %s1145_s24, 4  ;;  %s825_s25 = int_to_ptr.vmem [resolvable:$true] %s824_s25 }
  0x21   :  { %933 = vmatpush3.msra.mxu0 %v46_v1  ;;  %v70_v18 = vld [vmem:[#allocation5 + $0xc0] sm:$0xff]  ;;  %v69_v21 = vld [vmem:[#allocation5 + $0xb8] sm:$0xff]  ;;  %v68_v22 = vld [vmem:[#allocation5 + $0xb0] sm:$0xff]  ;;  %s1110_s26 = scalar_lea.vmem %s825_s25, 256  ;;  %p1115_p11 = scmp.lt.s32.totalorder %s825_s25, %s825_s25 }
  0x22   :  { %934 = vmatprep.subr.mxu0 %v45_v3  ;;  %v67_v25 = vld [vmem:[#allocation5 + $0xa8] sm:$0xff]  ;;  %v66_v26 = vld [vmem:[#allocation5 + $0xa0] sm:$0xff]  ;;  %v65_v29 = vld [vmem:[#allocation5 + $0x98] sm:$0xff]  ;;  %p1111_p10 = scmp.ne.s32.totalorder %s825_s25, %s1110_s26  ;;  %p1116_p12 = scmp.lt.s32.totalorder %s1110_s26, %s1110_s26 }
  0x23   :  { %935 = vmatpush3.msra.mxu0 %v45_v3  ;;  %v64_v30 = vld [vmem:[#allocation5 + $0x90] sm:$0xff]  ;;  %v63_v33 = vld [vmem:[#allocation5 + $0x88] sm:$0xff]  ;;  %v62_v34 = vld [vmem:[#allocation5 + $0x80] sm:$0xff] }
  0x24   :  { %936 = vmatprep.subr.mxu0 %v44_v4  ;;  %v61_v37 = vld [vmem:[#allocation5 + $0x78] sm:$0xff]  ;;  %v60_v39 = vld [vmem:[#allocation5 + $0x70] sm:$0xff]  ;;  %v59_v41 = vld [vmem:[#allocation5 + $0x68] sm:$0xff]  ;;  %p1117_p13 = por %p1116_p12, %p1115_p11 }
  0x25   :  { %937 = vmatpush3.msra.mxu0 %v44_v4  ;;  %v41_v59 = vld [vmem:[#allocation2 + $0x10] sm:$0xff]  ;;  %v40_v61 = vld [vmem:[#allocation2] sm:$0xff] }
  0x26   :  { %939 = vmatmul.mubr.msk.f32.vlgmr.msra.gmra.mxu0 %vm79_vm0, %v1174_v5  ;;  %p1118_p0 = pnand %p1117_p13, %p1111_p10 }
  0xe6   :  { %v940_v7 = vpop.f32.mrf.mxu0 }
  0xe7   :  { %v1178_v9 = vadd.f32 %v940_v7, %v837_v6 }
  0xe8   :  { %v152_v10 = vpop.f32.mrf.mxu0 }
  0xe9   :  { %v1180_v12 = vadd.f32 %v837_v6, %v152_v10  ;;  %v176_v13 = vmul.f32 %v1178_v9, %v74_v8  ;;  %v174_v16 = vmul.f32 %v1178_v9, %v72_v14  ;;  %v172_v20 = vmul.f32 %v1178_v9, %v70_v18  ;;  %v54_v14 = vld [vmem:[#allocation5 + $0x50] sm:$0xff]  ;;  %v52_v18 = vld [vmem:[#allocation5 + $0x40] sm:$0xff] }
  0xea   :  { %v170_v24 = vmul.f32 %v1178_v9, %v68_v22  ;;  %v168_v28 = vmul.f32 %v1178_v9, %v66_v26  ;;  %v166_v32 = vmul.f32 %v1178_v9, %v64_v30  ;;  %v164_v36 = vmul.f32 %v1178_v9, %v62_v34 }
  0xeb   :  { %350 = vrot.lane.b32.xlu1 %v176_v13, %s1142_s0  ;;  %941 = vmatprep.subr.msk.mxu1 %vm79_vm0, %v176_v13  ;;  %v175_v15 = vmul.f32 %v1180_v12, %v73_v11  ;;  %v173_v19 = vmul.f32 %v1180_v12, %v71_v17  ;;  %v171_v23 = vmul.f32 %v1180_v12, %v69_v21  ;;  %v53_v17 = vld [vmem:[#allocation5 + $0x48] sm:$0xff] }
  0xec   :  { %179 = vrot.lane.b32.xlu0 %v1180_v12, %s1143_s1  ;;  %942 = vmatpush3.xpose.msk.msra.mxu1 %vm79_vm0, %v176_v13  ;;  %v169_v27 = vmul.f32 %v1180_v12, %v67_v25  ;;  %v167_v31 = vmul.f32 %v1180_v12, %v65_v29  ;;  %v165_v35 = vmul.f32 %v1180_v12, %v63_v33  ;;  %v55_v13 = vld [vmem:[#allocation5 + $0x58] sm:$0xff] }
  0xed   :  { %943 = vmatprep.subr.msk.mxu1 %vm79_vm0, %v175_v15  ;;  %v163_v38 = vmul.f32 %v1180_v12, %v61_v37  ;;  %v162_v40 = vmul.f32 %v1178_v9, %v60_v39  ;;  %v161_v42 = vmul.f32 %v1180_v12, %v59_v41 }
  0xef   :  { %346 = vrot.lane.b32.xlu1 %v174_v16, %s1142_s0 }
  0xf0   :  { %181 = vrot.lane.b32.xlu0 %v1178_v9, %s1143_s1  ;;  %944 = vmatpush3.xpose.msk.msra.mxu1 %vm79_vm0, %v175_v15 }
  0xf1   :  { %945 = vmatprep.subr.msk.mxu1 %vm79_vm0, %v174_v16 }
  0xf3   :  { %344 = vrot.lane.b32.xlu1 %v173_v19, %s1142_s0 }
  0xf4   :  { %342 = vrot.lane.b32.xlu0 %v172_v20, %s1142_s0  ;;  %946 = vmatpush3.xpose.msk.msra.mxu1 %vm79_vm0, %v174_v16 }
  0xf5   :  { %947 = vmatprep.subr.msk.mxu1 %vm79_vm0, %v173_v19 }
  0xf7   :  { %340 = vrot.lane.b32.xlu1 %v171_v23, %s1142_s0 }
  0xf8   :  { %338 = vrot.lane.b32.xlu0 %v170_v24, %s1142_s0  ;;  %948 = vmatpush3.xpose.msk.msra.mxu1 %vm79_vm0, %v173_v19 }
  0xf9   :  { %949 = vmatprep.subr.msk.mxu1 %vm79_vm0, %v172_v20 }
  0xfb   :  { %336 = vrot.lane.b32.xlu1 %v169_v27, %s1142_s0 }
  0xfc   :  { %334 = vrot.lane.b32.xlu0 %v168_v28, %s1142_s0  ;;  %950 = vmatpush3.xpose.msk.msra.mxu1 %vm79_vm0, %v172_v20 }
  0xfd   :  { %951 = vmatprep.subr.msk.mxu1 %vm79_vm0, %v171_v23 }
  0xff   :  { %332 = vrot.lane.b32.xlu1 %v167_v31, %s1142_s0 }
 0x100   :  { %330 = vrot.lane.b32.xlu0 %v166_v32, %s1142_s0  ;;  %952 = vmatpush3.xpose.msk.msra.mxu1 %vm79_vm0, %v171_v23 }
 0x101   :  { %953 = vmatprep.subr.msk.mxu1 %vm79_vm0, %v170_v24 }
 0x103   :  { %328 = vrot.lane.b32.xlu1 %v165_v35, %s1142_s0 }
 0x104   :  { %326 = vrot.lane.b32.xlu0 %v164_v36, %s1142_s0  ;;  %954 = vmatpush3.xpose.msk.msra.mxu1 %vm79_vm0, %v170_v24 }
 0x105   :  { %955 = vmatprep.subr.msk.mxu1 %vm79_vm0, %v169_v27 }
 0x107   :  { %324 = vrot.lane.b32.xlu1 %v163_v38, %s1142_s0 }
 0x108   :  { %348 = vrot.lane.b32.xlu0 %v175_v15, %s1142_s0  ;;  %956 = vmatpush3.xpose.msk.msra.mxu1 %vm79_vm0, %v169_v27 }
 0x109   :  { %957 = vmatprep.subr.msk.mxu1 %vm79_vm0, %v168_v28 }
 0x10c   :  { %958 = vmatpush3.xpose.msk.msra.mxu1 %vm79_vm0, %v168_v28 }
 0x10d   :  { %959 = vmatprep.subr.msk.mxu1 %vm79_vm0, %v167_v31 }
 0x110   :  { %960 = vmatpush3.xpose.msk.msra.mxu1 %vm79_vm0, %v167_v31  ;;  %v858_v31 = vld [vmem:[#allocation5 + $0x61] ss:$0 sm:$0xff] }
 0x111   :  { %961 = vmatprep.subr.msk.mxu1 %vm79_vm0, %v166_v32 }
 0x114   :  { %962 = vmatpush3.xpose.msk.msra.mxu1 %vm79_vm0, %v166_v32 }
 0x115   :  { %963 = vmatprep.subr.msk.mxu1 %vm79_vm0, %v165_v35 }
 0x118   :  { %964 = vmatpush3.xpose.msk.msra.mxu1 %vm79_vm0, %v165_v35 }
 0x119   :  { %965 = vmatprep.subr.msk.mxu1 %vm79_vm0, %v164_v36 }
 0x11c   :  { %966 = vmatpush3.xpose.msk.msra.mxu1 %vm79_vm0, %v164_v36 }
 0x11d   :  { %967 = vmatprep.subr.msk.mxu1 %vm79_vm0, %v163_v38 }
 0x120   :  { %968 = vmatpush3.xpose.msk.msra.mxu1 %vm79_vm0, %v163_v38 }
 0x121   :  { %969 = vmatprep.subr.msk.mxu1 %vm79_vm0, %v162_v40 }
 0x124   :  { %970 = vmatpush3.xpose.msk.msra.mxu1 %vm79_vm0, %v162_v40 }
 0x125   :  { %971 = vmatprep.subr.msk.mxu1 %vm79_vm0, %v161_v42 }
 0x128   :  { %972 = vmatpush3.xpose.msk.msra.mxu1 %vm79_vm0, %v161_v42 }
 0x15d   :  { %v351_v43 = vpop.permute.xlu1 %350 }
 0x15e   :  { %v180_v44 = vpop.permute.xlu0 %179  ;;  %976 = vmatprep.subr.mxu0 %v351_v43 }
 0x15f   :  { %973 = vmatprep.mubr.msk.f32.mxu1 %vm79_vm0, %v180_v44  ;;  %977 = vmatpush3.msra.mxu0 %v351_v43 }
 0x161   :  { %v347_v48 = vpop.permute.xlu1 %346 }
 0x162   :  { %v182_v45 = vpop.permute.xlu0 %181 }
 0x163   :  { %974 = vmatmul.mubr.msk.f32.vlgmr.msra.gmra.mxu1 %vm79_vm0, %v182_v45 }
 0x165   :  { %v345_v51 = vpop.permute.xlu1 %344 }
 0x166   :  { %v343_v46 = vpop.permute.xlu0 %342 }
 0x169   :  { %v341_v53 = vpop.permute.xlu1 %340 }
 0x16a   :  { %v339_v47 = vpop.permute.xlu0 %338 }
 0x16d   :  { %v337_v55 = vpop.permute.xlu1 %336 }
 0x16e   :  { %v335_v49 = vpop.permute.xlu0 %334 }
 0x171   :  { %v333_v56 = vpop.permute.xlu1 %332 }
 0x172   :  { %v331_v50 = vpop.permute.xlu0 %330 }
 0x175   :  { %v329_v57 = vpop.permute.xlu1 %328 }
 0x176   :  { %v327_v52 = vpop.permute.xlu0 %326 }
 0x179   :  { %v325_v58 = vpop.permute.xlu1 %324 }
 0x17a   :  { %v349_v54 = vpop.permute.xlu0 %348 }
 0x17b   :  { %978 = vmatprep.subr.mxu0 %v349_v54 }
 0x17c   :  { %979 = vmatpush3.msra.mxu0 %v349_v54 }
 0x17d   :  { %980 = vmatprep.subr.mxu0 %v347_v48 }
 0x17e   :  { %981 = vmatpush3.msra.mxu0 %v347_v48 }
 0x17f   :  { %982 = vmatprep.subr.mxu0 %v345_v51 }
 0x180   :  { %983 = vmatpush3.msra.mxu0 %v345_v51  ;;  %v49_v51 = vld [vmem:[#allocation5 + $0x28] sm:$0xff] }
 0x181   :  { %984 = vmatprep.subr.mxu0 %v343_v46 }
 0x182   :  { %985 = vmatpush3.msra.mxu0 %v343_v46 }
 0x183   :  { %986 = vmatprep.subr.mxu0 %v341_v53 }
 0x184   :  { %987 = vmatpush3.msra.mxu0 %v341_v53 }
 0x185   :  { %988 = vmatprep.subr.mxu0 %v339_v47 }
 0x186   :  { %989 = vmatpush3.msra.mxu0 %v339_v47 }
 0x187   :  { %990 = vmatprep.subr.mxu0 %v337_v55 }
 0x188   :  { %991 = vmatpush3.msra.mxu0 %v337_v55 }
 0x189   :  { %992 = vmatprep.subr.mxu0 %v335_v49 }
 0x18a   :  { %993 = vmatpush3.msra.mxu0 %v335_v49  ;;  %v51_v49 = vld [vmem:[#allocation5 + $0x38] sm:$0xff] }
 0x18b   :  { %994 = vmatprep.subr.mxu0 %v333_v56 }
 0x18c   :  { %995 = vmatpush3.msra.mxu0 %v333_v56 }
 0x18d   :  { %996 = vmatprep.subr.mxu0 %v331_v50 }
 0x18e   :  { %997 = vmatpush3.msra.mxu0 %v331_v50  ;;  %v50_v50 = vld [vmem:[#allocation5 + $0x30] sm:$0xff] }
 0x18f   :  { %998 = vmatprep.subr.mxu0 %v329_v57 }
 0x190   :  { %999 = vmatpush3.msra.mxu0 %v329_v57 }
 0x191   :  { %1000 = vmatprep.subr.mxu0 %v327_v52 }
 0x192   :  { %1001 = vmatpush3.msra.mxu0 %v327_v52  ;;  %v48_v52 = vld [vmem:[#allocation5 + $0x20] sm:$0xff] }
 0x193   :  { %1002 = vmatprep.subr.mxu0 %v325_v58 }
 0x194   :  { %1003 = vmatpush3.msra.mxu0 %v325_v58 }
 0x223   :  { %v975_v60 = vpop.f32.mrf.mxu1 }
 0x224   :  { %v307_v62 = vadd.f32 %v975_v60, %v41_v59 }
 0x225   :  { %v301_v63 = vpop.f32.mrf.mxu1 }
 0x226   :  { %v302_v0 = vadd.f32 %v301_v63, %v40_v61  ;;  %312 = vmax.xlane.f32.xlu0 %v307_v62 }
 0x228   :  { %310 = vmax.xlane.f32.xlu1 %v302_v0 }
 0x239   :  { %320 = vrot.lane.b32.xlu1 %v161_v42, %s1142_s0 }
 0x23c   :  { %322 = vrot.lane.b32.xlu0 %v162_v40, %s1142_s0  ;;  %v1260_v40 = vld [vmem:[#allocation5 + $0x62] ss:$0 sm:$0xff] }
 0x2af   :  { %v313_v1 = vpop.xlane.xlu0 %312 }
 0x2b0   :  { %v315_v3 = vsub.f32 %v307_v62, %v313_v1 }
 0x2b1   :  { %v311_v4 = vpop.xlane.xlu1 %310 }
 0x2b2   :  { %v314_v6 = vsub.f32 %v302_v0, %v311_v4  ;;  %v318_v7 = vmul.f32 1.442695, %v315_v3 }
 0x2b3   :  { %v323_v8 = vpop.permute.xlu0 %322 }
 0x2b4   :  { %v316_v9 = vmul.f32 1.442695, %v314_v6  ;;  %1004 = vmatprep.subr.mxu0 %v323_v8 }
 0x2b5   :  { %v321_v10 = vpop.permute.xlu1 %320  ;;  %1005 = vmatpush3.msra.mxu0 %v323_v8 }
 0x2b6   :  { %1054 = vpow2.f32 %v316_v9  ;;  %1006 = vmatprep.subr.mxu0 %v321_v10 }
 0x2b7   :  { %1056 = vpow2.f32 %v318_v7  ;;  %1007 = vmatpush3.msra.mxu0 %v321_v10 }
 0x2b8   :  { %1011 = vmatprep.subr.mxu0 %v55_v13 }
 0x2c3   :  { %v1055_v11 = vpop.eup %1054 }
 0x2c4   :  { %v1057_v12 = vpop.eup %1056  ;;  %1008 = vmatprep.mubr.f32.mxu0 %v1055_v11 }
 0x2c5   :  { %1009 = vmatmul.mubr.f32.vlgmr.msra.gmra.mxu0 %v1057_v12 }
 0x2c6   :  { %1012 = vmatpush3.msra.mxu0 %v55_v13 }
 0x2c7   :  { %1013 = vmatprep.subr.mxu0 %v54_v14 }
 0x2c8   :  { %1014 = vmatpush3.msra.mxu0 %v54_v14 }
 0x2c9   :  { %1015 = vmatprep.subr.mxu0 %v53_v17 }
 0x2ca   :  { %1016 = vmatpush3.msra.mxu0 %v53_v17 }
 0x2cb   :  { %1017 = vmatprep.subr.mxu0 %v52_v18 }
 0x2cc   :  { %1018 = vmatpush3.msra.mxu0 %v52_v18 }
 0x2cd   :  { %1022 = vmatprep.subr.mxu0 %v51_v49 }
 0x385   :  { %v1010_v15 = vpop.f32.mrf.mxu0 }
 0x386   :  { %1058 = vrcp.f32 %v1010_v15 }
 0x387   :  { %v434_v16 = vpop.f32.mrf.mxu0 }
 0x388   :  { %1060 = vrcp.f32 %v434_v16 }
 0x393   :  { %v1059_v19 = vpop.eup %1058 }
 0x394   :  { %v446_v20 = vmul.f32 %v1059_v19, %v1010_v15 }
 0x395   :  { %v1061_v21 = vpop.eup %1060 }
 0x396   :  { %v448_v22 = vsub.f32 2.0, %v446_v20  ;;  %v445_v23 = vmul.f32 %v1061_v21, %v434_v16 }
 0x398   :  { %v447_v24 = vsub.f32 2.0, %v445_v23  ;;  %v450_v25 = vmul.f32 %v1059_v19, %v448_v22 }
 0x39a   :  { %455 = vrot.lane.b32.xlu1 %v450_v25, %s1142_s0  ;;  %v449_v26 = vmul.f32 %v1061_v21, %v447_v24 }
 0x39c   :  { %453 = vrot.lane.b32.xlu0 %v449_v26, %s1142_s0 }
 0x40c   :  { %v456_v27 = vpop.permute.xlu1 %455 }
 0x40d   :  { %v460_v30 = vmul.f32 %v1010_v15, %v456_v27 }
 0x40e   :  { %v454_v28 = vpop.permute.xlu0 %453 }
 0x40f   :  { %v459_v29 = vmul.f32 %v454_v28, %v434_v16 }
 0x411   :  { %1019 = vmatprep.mubr.msk.f32.mxu0 %vm79_vm0, %v459_v29 }
 0x412   :  { %1020 = vmatmul.mubr.msk.f32.vlgmr.msra.gmra.mxu0 %vm79_vm0, %v460_v30 }
 0x413   :  { %1023 = vmatpush3.msra.mxu0 %v51_v49 }
 0x414   :  { %1024 = vmatprep.subr.mxu0 %v50_v50 }
 0x415   :  { %1025 = vmatpush3.msra.mxu0 %v50_v50 }
 0x416   :  { %1026 = vmatprep.subr.mxu0 %v49_v51 }
 0x417   :  { %1027 = vmatpush3.msra.mxu0 %v49_v51 }
 0x418   :  { %1028 = vmatprep.subr.mxu0 %v48_v52 }
 0x419   :  { %1029 = vmatpush3.msra.mxu0 %v48_v52 }
 0x4d2   :  { %v1021_v32 = vpop.f32.mrf.mxu0 }
 0x4d3   :  { %v543_v33 = vadd.f32 %v1021_v32, %v858_v31 }
 0x4d4   :  { %v537_v34 = vpop.f32.mrf.mxu0 }
 0x4d5   :  { %v538_v35 = vadd.f32 %v858_v31, %v537_v34  ;;  %v547_v36 = vadd.f32 %v543_v33, %v1174_v5 }
 0x4d7   :  { %v551_v37 = vsel %vm79_vm0, %v547_v36, 0.0  ;;  %v546_v38 = vadd.f32 %v538_v35, %v1170_v2 }
 0x4d8   :  { %552 = vadd.xlane.f32.xlu1 %v551_v37 }
 0x4d9   :  { %v548_v39 = vsel %vm79_vm0, %v546_v38, 0.0 }
 0x4da   :  { %549 = vadd.xlane.f32.xlu0 %v548_v39 }
 0x4e9   :  { %582 = vrot.lane.b32.xlu1 %v1260_v40, %s1142_s0 }
 0x4ed   :  { %682 = vrot.lane.b32.xlu1 %v50_v50, %s1144_s23 }
 0x4f1   :  { %680 = vrot.lane.b32.xlu1 %v49_v51, %s1144_s23 }
 0x4f5   :  { %678 = vrot.lane.b32.xlu1 %v48_v52, %s1144_s23 }
 0x561   :  { %v553_v41 = vpop.xlane.xlu1 %552 }
 0x562   :  { %v556_v42 = vmul.f32 0.03125, %v553_v41 }
 0x563   :  { %v550_v43 = vpop.xlane.xlu0 %549 }
 0x564   :  { %v555_v44 = vmul.f32 0.03125, %v550_v43  ;;  %v558_v45 = vsub.f32 %v547_v36, %v556_v42 }
 0x565   :  { %v583_v62 = vpop.permute.xlu1 %582 }
 0x566   :  { %v557_v46 = vsub.f32 %v546_v38, %v555_v44  ;;  %v560_v48 = vmul.f32 %v558_v45, %v558_v45 }
 0x568   :  { %v559_v5 = vmul.f32 %v557_v46, %v557_v46  ;;  %v564_v2 = vsel %vm79_vm0, %v560_v48, 0.0 }
 0x569   :  { %v683_v6 = vpop.permute.xlu1 %682 }
 0x56a   :  { %v561_v47 = vsel %vm79_vm0, %v559_v5, 0.0 }
 0x56b   :  { %562 = vadd.xlane.f32.xlu0 %v561_v47 }
 0x56d   :  { %v681_v8 = vpop.permute.xlu1 %680 }
 0x56f   :  { %565 = vadd.xlane.f32.xlu0 %v564_v2 }
 0x571   :  { %v679_v9 = vpop.permute.xlu1 %678 }
 0x585   :  { %684 = vrot.lane.b32.xlu0 %v51_v49, %s1144_s23 }
 0x589   :  { %588 = vrot.lane.b32.xlu0 %v858_v31, %s1142_s0 }
 0x58d   :  { %686 = vrot.lane.b32.xlu0 %v858_v31, %s1143_s1 }
 0x5f4   :  { %v563_v53 = vpop.xlane.xlu0 %562 }
 0x5f5   :  { %v567_v54 = vmul.f32 0.03125, %v563_v53 }
 0x5f7   :  { %v569_v55 = vadd.f32 1e-05, %v567_v54 }
 0x5f8   :  { %v566_v56 = vpop.xlane.xlu0 %565 }
 0x5f9   :  { %1062 = vrsqrt.f32 %v569_v55  ;;  %v568_v57 = vmul.f32 0.03125, %v566_v56 }
 0x5fb   :  { %v570_v58 = vadd.f32 1e-05, %v568_v57 }
 0x5fc   :  { %v685_v59 = vpop.permute.xlu0 %684 }
 0x5fd   :  { %1064 = vrsqrt.f32 %v570_v58  ;;  %1033 = vmatprep.subr.msk.mxu0 %vm689_vm1, %v685_v59 }
 0x600   :  { %v589_v10 = vpop.permute.xlu0 %588 }
 0x604   :  { %v687_v17 = vpop.permute.xlu0 %686 }
 0x606   :  { %v1063_v60 = vpop.eup %1062 }
 0x607   :  { %v573_v61 = vmul.f32 %v1063_v60, %v557_v46 }
 0x609   :  { %v579_v63 = vmul.f32 %v1260_v40, %v573_v61 }
 0x60a   :  { %v1065_v0 = vpop.eup %1064 }
 0x60b   :  { %v574_v1 = vmul.f32 %v1065_v0, %v558_v45  ;;  %v585_v3 = vadd.f32 %v583_v62, %v579_v63 }
 0x60d   :  { %v580_v4 = vmul.f32 %v1260_v40, %v574_v1  ;;  %1030 = vmatprep.mubr.msk.f32.mxu0 %vm79_vm0, %v585_v3 }
 0x60f   :  { %v586_v7 = vadd.f32 %v583_v62, %v580_v4 }
 0x611   :  { %1031 = vmatmul.mubr.msk.f32.vlgmr.msra.gmra.mxu0 %vm79_vm0, %v586_v7 }
 0x612   :  { %1034 = vmatpush3.xpose.msk.msra.mxu0 %vm689_vm1, %v685_v59 }
 0x613   :  { %1035 = vmatprep.subr.msk.mxu0 %vm689_vm1, %v683_v6 }
 0x616   :  { %1036 = vmatpush3.xpose.msk.msra.mxu0 %vm689_vm1, %v683_v6 }
 0x617   :  { %1037 = vmatprep.subr.msk.mxu0 %vm689_vm1, %v681_v8 }
 0x61a   :  { %1038 = vmatpush3.xpose.msk.msra.mxu0 %vm689_vm1, %v681_v8 }
 0x61b   :  { %1039 = vmatprep.subr.msk.mxu0 %vm689_vm1, %v679_v9 }
 0x61e   :  { %1040 = vmatpush3.xpose.msk.msra.mxu0 %vm689_vm1, %v679_v9 }
 0x6d1   :  { %v1032_v11 = vpop.f32.mrf.mxu0 }
 0x6d2   :  { %v669_v12 = vadd.f32 %v1032_v11, %v589_v10 }
 0x6d3   :  { %v663_v13 = vpop.f32.mrf.mxu0 }
 0x6d4   :  { %v664_v14 = vadd.f32 %v663_v13, %v589_v10  ;;  %v673_v16 = vmax.f32 %v669_v12, 0.0 }
 0x6d6   :  { %v672_v15 = vmax.f32 %v664_v14, 0.0 }
 0x6d8   :  { %1041 = vmatprep.mubr.msk.f32.mxu0 %vm689_vm1, %v672_v15 }
 0x6d9   :  { %1042 = vmatmul.mubr.msk.f32.vlgmr.msra.gmra.mxu0 %vm689_vm1, %v673_v16 }
 0x799   :  { %v1043_v18 = vpop.f32.mrf.mxu0 }
 0x79a   :  { %v776_v19 = vadd.f32 %v1043_v18, %v687_v17 }
 0x79b   :  { %v770_v20 = vpop.f32.mrf.mxu0 }
 0x79c   :  { %v771_v21 = vadd.f32 %v770_v20, %v687_v17  ;;  %v780_v22 = vadd.f32 %v776_v19, %v586_v7 }
 0x79e   :  { %v784_v23 = vsel %vm79_vm0, %v780_v22, 0.0  ;;  %v779_v24 = vadd.f32 %v771_v21, %v585_v3 }
 0x79f   :  { %785 = vadd.xlane.f32.xlu0 %v784_v23 }
 0x7a0   :  { %v781_v25 = vsel %vm79_vm0, %v779_v24, 0.0 }
 0x7a1   :  { %782 = vadd.xlane.f32.xlu1 %v781_v25 }
 0x828   :  { %v786_v26 = vpop.xlane.xlu0 %785 }
 0x829   :  { %v788_v27 = vmul.f32 0.03125, %v786_v26 }
 0x82a   :  { %v783_v28 = vpop.xlane.xlu1 %782 }
 0x82b   :  { %v790_v29 = vsub.f32 %v780_v22, %v788_v27  ;;  %v787_v30 = vmul.f32 0.03125, %v783_v28 }
 0x82d   :  { %v789_v31 = vsub.f32 %v779_v24, %v787_v30  ;;  %v792_v32 = vmul.f32 %v790_v29, %v790_v29 }
 0x82f   :  { %v796_v33 = vsel %vm79_vm0, %v792_v32, 0.0  ;;  %v791_v34 = vmul.f32 %v789_v31, %v789_v31 }
 0x830   :  { %797 = vadd.xlane.f32.xlu1 %v796_v33 }
 0x831   :  { %v793_v35 = vsel %vm79_vm0, %v791_v34, 0.0 }
 0x832   :  { %794 = vadd.xlane.f32.xlu0 %v793_v35 }
 0x841   :  { %812 = vrot.lane.b32.xlu1 %v1260_v40, %s1143_s1 }
 0x848   :  { %807 = vrot.lane.b32.xlu0 %v1260_v40, %s1144_s23 }
 0x8b9   :  { %v798_v36 = vpop.xlane.xlu1 %797 }
 0x8ba   :  { %v800_v37 = vmul.f32 0.03125, %v798_v36 }
 0x8bb   :  { %v795_v38 = vpop.xlane.xlu0 %794 }
 0x8bc   :  { %v802_v39 = vadd.f32 1e-05, %v800_v37  ;;  %v799_v41 = vmul.f32 0.03125, %v795_v38 }
 0x8bd   :  { %v813_v5 = vpop.permute.xlu1 %812 }
 0x8be   :  { %1066 = vrsqrt.f32 %v802_v39  ;;  %v801_v42 = vadd.f32 1e-05, %v799_v41 }
 0x8bf   :  { %v808_v44 = vpop.permute.xlu0 %807 }
 0x8c0   :  { %1068 = vrsqrt.f32 %v801_v42 }
 0x8cb   :  { %v1067_v43 = vpop.eup %1066 }
 0x8cc   :  { %v806_v45 = vmul.f32 %v1067_v43, %v790_v29 }
 0x8cd   :  { %v1069_v46 = vpop.eup %1068 }
 0x8ce   :  { %v805_v47 = vmul.f32 %v1069_v46, %v789_v31  ;;  %v811_v48 = vmul.f32 %v808_v44, %v806_v45 }
 0x8d0   :  { %v810_v2 = vmul.f32 %v808_v44, %v805_v47  ;;  %v816_v49 = vadd.f32 %v813_v5, %v811_v48 }
 0x8d2   :  { %v815_v40 = vadd.f32 %v813_v5, %v810_v2  ;;  %818 = vst.msk [vmem:[#allocation7 + $0x8] sm:$0xff] %vm79_vm0, %v816_v49 }
 0x8d4   :  { %817 = vst.msk [vmem:[#allocation7] sm:$0xff] %vm79_vm0, %v815_v40 }
 0x8d5   :  { %1121 = shalt.err (!%p1118_p0)
}
 0x8d6   :  { %830 = dma.vmem_to_hbm [thread:$0]  %s825_s25, 256, %s1304_s2, [#allocation4], %s1140_s19, %s1140_s19, %s1141_s20  }
 0x8d7   :  { %1134 = dma.done.wait [#allocation4], 256  }
 0x8d8   :  { %1135 = vsyncadd [#allocation4], 4294967040 }
 0x8d9   :  { %834 = vsyncpa [#allocation3], 1 }
 0x8da   :  { %835 = vsyncpa [#allocation6], 1 }
 0x8db   :  { %836 = vsyncpa [#allocation4], 1 }

</bundles_post_ra>
